<compile_context>
chip_gen: v5e
topology: v5e:2x2
jax: 0.10.0
libtpu: 0.0.40
codegen_flags: <defaults>
</compile_context>

<pallas_src>
import functools
import math

import jax
import jax.numpy as jnp
from jax.experimental import pallas as pl
from jax.experimental.pallas import tpu as pltpu

_EPS = 1e-7
_MIB = 1024 * 1024


def _cdiv(a: int, b: int) -> int:
    return -(-a // b)


def _round_up(x: int, m: int) -> int:
    return ((x + m - 1) // m) * m


@functools.lru_cache(maxsize=1)
def _budgets():
    """Returns (vmem_limit_cap_bytes, target_tile_bytes), generation-aware."""
    vmem = 64 * _MIB
    try:
        vmem = int(getattr(pltpu.get_tpu_info(), "vmem_capacity_bytes", vmem))
    except Exception:
        pass
    if vmem >= 100 * _MIB:            # v5e / v6e: 128 MiB VMEM per TensorCore
        return 96 * _MIB, 8 * _MIB
    return 48 * _MIB, 4 * _MIB        # v7x: 64 MiB VMEM per TensorCore


def _finish(xf, sum_p, power, out_dtype):
    """sum(x^p) -> norm -> 1/(norm+eps) via EUP rcp + 1 Newton step -> scale in f32."""
    if power == 2:
        norm = jnp.sqrt(sum_p)
    else:
        # Mirrors PyTorch: odd p with negative channel sums can produce NaN.
        norm = jnp.power(sum_p, 1.0 / power)
    d = norm + _EPS
    inv = pl.reciprocal(d, approx=True)        # EUP vrcp (separate VLIW slot)
    inv = inv * (2.0 - d * inv)                # one Newton step -> ~f32-exact 1/d
    # Multiply in f32 (no bf16 round-trip of inv); cast once on store.
    return (xf * inv).astype(out_dtype)


def _kernel_reduce_c(x_ref, o_ref, *, power):
    # x_ref / o_ref: (bn, C, t). Reduce over C (sublanes); t (lanes) stays dense.
    xf = x_ref[...].astype(jnp.float32)
    if power == 2:
        s = jnp.sum(xf * xf, axis=1, keepdims=True)
    else:
        s = jnp.sum(jnp.power(xf, power), axis=1, keepdims=True)   # static int -> integer_pow
    o_ref[...] = _finish(xf, s, power, o_ref.dtype)


def _kernel_reduce_lane(x_ref, o_ref, *, power):
    # x_ref / o_ref: (tr, C). Reduce over C (lanes).
    xf = x_ref[...].astype(jnp.float32)
    if power == 2:
        s = jnp.sum(xf * xf, axis=-1, keepdims=True)
    else:
        s = jnp.sum(jnp.power(xf, power), axis=-1, keepdims=True)
    o_ref[...] = _finish(xf, s, power, o_ref.dtype)


def _plan_ncl(N, C, L, itemsize, target_bytes):
    """Pick (bn, t): images per step and lane tile (multiple of 128, or exactly L)."""
    L128 = _round_up(max(L, 1), 128)
    row_bytes = max(C * itemsize, 1)
    t = max(128, (target_bytes // row_bytes) // 128 * 128)
    t = min(t, L128)
    bn = 1
    if t >= L128:                                   # whole spatial extent fits one tile
        per_image = row_bytes * L128
        bn = max(1, min(N, target_bytes // per_image))
    # v7x has 2 TensorCores: prefer >= 2 grid steps when there is enough data.
    if _cdiv(N, bn) * _cdiv(L, t) < 2 and N * C * L * itemsize >= _MIB:
        if bn >= N and N >= 2:
            bn = max(1, (N + 1) // 2)
        elif L128 >= 256:
            t = max(128, _round_up(L128 // 2, 128))
    if t >= L:
        t = L                                       # single lane block: use exact extent
    return bn, t


def _normalize_ncl(x3: jax.Array, power: int) -> jax.Array:
    """x3: (N, C, L); normalize over axis 1 (C on sublanes, L on lanes)."""
    N, C, L = x3.shape
    itemsize = x3.dtype.itemsize
    vmem_cap, target = _budgets()
    bn, t = _plan_ncl(N, C, L, itemsize, target)

    tile_bytes = bn * C * t * itemsize
    # Double-buffered in + out = 4 * tile; 6x leaves headroom for internal scratch.
    vmem_limit = int(min(vmem_cap, max(16 * _MIB, 6 * tile_bytes)))

    kernel = functools.partial(_kernel_reduce_c, power=power)

    return pl.pallas_call(
        kernel,
        out_shape=jax.ShapeDtypeStruct((N, C, L), x3.dtype),
        grid_spec=pltpu.PrefetchScalarGridSpec(
            num_scalar_prefetch=0,
            grid=(_cdiv(N, bn), _cdiv(L, t)),
            in_specs=[pl.BlockSpec((bn, C, t), lambda n, j: (n, 0, j))],
            out_specs=pl.BlockSpec((bn, C, t), lambda n, j: (n, 0, j)),
        ),
        compiler_params=pltpu.CompilerParams(
            dimension_semantics=("parallel", "parallel"),
            vmem_limit_bytes=vmem_limit,
        ),
        cost_estimate=pl.CostEstimate(
            flops=int(3 * N * C * L),
            transcendentals=int(2 * N * L),
            bytes_accessed=int(2 * N * C * L * itemsize),
        ),
    )(x3)


def _normalize_rc(x2: jax.Array, power: int) -> jax.Array:
    """x2: (R, C); normalize each row over C (last / lane axis)."""
    R, C = x2.shape
    itemsize = x2.dtype.itemsize
    vmem_cap, target = _budgets()

    row_bytes = max(C * itemsize, 1)
    tr = max(8, (target // row_bytes) // 8 * 8)
    tr = min(tr, _round_up(max(R, 1), 8))
    if _cdiv(R, tr) < 2 and R * C * itemsize >= _MIB and R >= 16:
        tr = max(8, _round_up(_cdiv(R, 2), 8))      # >= 2 steps for v7x megacore
    if tr >= R:
        tr = R

    tile_bytes = tr * C * itemsize
    vmem_limit = int(min(vmem_cap, max(16 * _MIB, 6 * tile_bytes)))

    kernel = functools.partial(_kernel_reduce_lane, power=power)

    return pl.pallas_call(
        kernel,
        out_shape=jax.ShapeDtypeStruct((R, C), x2.dtype),
        grid_spec=pltpu.PrefetchScalarGridSpec(
            num_scalar_prefetch=0,
            grid=(_cdiv(R, tr),),
            in_specs=[pl.BlockSpec((tr, C), lambda i: (i, 0))],
            out_specs=pl.BlockSpec((tr, C), lambda i: (i, 0)),
        ),
        compiler_params=pltpu.CompilerParams(
            dimension_semantics=("parallel",),
            vmem_limit_bytes=vmem_limit,
        ),
        cost_estimate=pl.CostEstimate(
            flops=int(3 * R * C),
            transcendentals=int(2 * R),
            bytes_accessed=int(2 * R * C * itemsize),
        ),
    )(x2)


def normalize(x: jax.Array, power: int = 2) -> jax.Array:
    """Pallas equivalent of Normalize(power).forward(x): L_p normalize over dim 1."""
    p = int(power)
    if p != power:
        # Keep power a static Python int so jnp.power lowers to integer_pow, not exp/log.
        raise ValueError("normalize: only integer `power` is supported (CUT uses p=2)")
    if x.ndim == 2:
        return _normalize_rc(x, p)
    if x.ndim >= 3:
        N, C = x.shape[0], x.shape[1]
        L = math.prod(x.shape[2:])
        out = _normalize_ncl(x.reshape(N, C, L), p)   # reshape is free (no transpose)
        return out.reshape(x.shape)
    raise ValueError(f"Normalize expects rank >= 2, got rank {x.ndim}")


def _reference(x: jax.Array, power: int = 2) -> jax.Array:
    norm = jnp.power(jnp.sum(jnp.power(x, power), axis=1, keepdims=True), 1.0 / power)
    return x / (norm + _EPS)


if __name__ == "__main__":
    key = jax.random.PRNGKey(0)
    k1, k2, k3 = jax.random.split(key, 3)

    # 4-D NCHW conv features (as in CUT), 2-D (N, C) patch features (PatchSampleF),
    # and a non-128-aligned spatial shape to exercise the ragged-extent path.
    x4 = jax.random.normal(k1, (2, 4, 16, 16), dtype=jnp.float32)
    x2 = jax.random.normal(k2, (16, 64), dtype=jnp.float32)
    x4b = jax.random.normal(k3, (1, 3, 10, 13), dtype=jnp.float32)

    for v in (x4, x2, x4b):
        o = jax.block_until_ready(normalize(v, power=2))
        r = _reference(v, power=2)
        assert o.shape == v.shape and o.dtype == v.dtype
        err = float(jnp.max(jnp.abs(o - r)))
        assert jnp.allclose(o, r, atol=2e-5, rtol=1e-4), f"max abs err {err}"

    print("KERNEL_OK")
</pallas_src>

<mosaic_0001>
module attributes {stable_mosaic.version = 11 : i64} {
  func.func @_kernel_reduce_c(%arg0: i32, %arg1: i32, %arg2: memref<2x4x256xf32, #tpu.memory_space<vmem>>, %arg3: memref<2x4x256xf32, #tpu.memory_space<vmem>>) attributes {dimension_semantics = [#tpu.dimension_semantics<parallel>, #tpu.dimension_semantics<parallel>], iteration_bounds = array<i64: 1, 1>, scalar_prefetch = 0 : i64, scratch_operands = 0 : i64, tpu.core_type = #tpu.core_type<tc>, window_params = [{transform_indices = @transform_0, window_bounds = array<i64: 2, 4, 256>}, {transform_indices = @transform_1, window_bounds = array<i64: 2, 4, 256>}]} {
    %c0 = arith.constant 0 : index
    %c0_0 = arith.constant 0 : index
    %c0_1 = arith.constant 0 : index
    %0 = vector.load %arg2[%c0, %c0_0, %c0_1] : memref<2x4x256xf32, #tpu.memory_space<vmem>>, vector<2x4x256xf32>
    %1 = arith.mulf %0, %0 : vector<2x4x256xf32>
    %cst = arith.constant dense<0.000000e+00> : vector<2x256xf32>
    %2 = vector.multi_reduction <add>, %1, %cst [1] : vector<2x4x256xf32> to vector<2x256xf32>
    %3 = vector.shape_cast %2 : vector<2x256xf32> to vector<2x1x256xf32>
    %4 = math.sqrt %3 : vector<2x1x256xf32>
    %cst_2 = arith.constant 1.000000e-07 : f32
    %5 = vector.broadcast %cst_2 : f32 to vector<2x1x256xf32>
    %6 = arith.addf %4, %5 : vector<2x1x256xf32>
    %7 = tpu.reciprocal %6 {approx = true} : vector<2x1x256xf32> -> vector<2x1x256xf32>
    %8 = arith.mulf %6, %7 : vector<2x1x256xf32>
    %cst_3 = arith.constant 2.000000e+00 : f32
    %9 = vector.broadcast %cst_3 : f32 to vector<2x1x256xf32>
    %10 = arith.subf %9, %8 : vector<2x1x256xf32>
    %11 = arith.mulf %7, %10 : vector<2x1x256xf32>
    %12 = vector.broadcast %11 : vector<2x1x256xf32> to vector<2x4x256xf32>
    %13 = arith.mulf %0, %12 : vector<2x4x256xf32>
    %c0_4 = arith.constant 0 : index
    %c0_5 = arith.constant 0 : index
    %c0_6 = arith.constant 0 : index
    %14 = vector.load %arg3[%c0_4, %c0_5, %c0_6] : memref<2x4x256xf32, #tpu.memory_space<vmem>>, vector<2x4x256xf32>
    tpu.vector_store %arg3[%c0_4, %c0_5, %c0_6], %13 {strides = array<i32>} : memref<2x4x256xf32, #tpu.memory_space<vmem>>, vector<2x4x256xf32>,
    return
  }
  func.func @transform_0(%arg0: i32, %arg1: i32) -> (i32, i32, i32) {
    %c0_i32 = arith.constant 0 : i32
    %c0_i32_0 = arith.constant 0 : i32
    return %arg0, %c0_i32, %arg1 : i32, i32, i32
  }
  func.func @transform_1(%arg0: i32, %arg1: i32) -> (i32, i32, i32) {
    %c0_i32 = arith.constant 0 : i32
    %c0_i32_0 = arith.constant 0 : i32
    return %arg0, %c0_i32, %arg1 : i32, i32, i32
  }
}

</mosaic_0001>

<bundles_post_ra>
// kernel: tpu_custom_call.1
= control target key start
LH: loop header
LB: loop body
LE: loop exit
PB: predicated region body
PF: predicated region fallthrough
CT: control target
= control target key end

     0   :  { %6 = vsyncpa [#allocation3], 0  ;;  %s287_s0 = inlined_call_operand.hbm [shape: f32[2,4,256], index: 0, kind: input, shape index: {}]   ;;  %s288_s1 = inlined_call_operand.hbm [shape: f32[2,4,256], index: 1, kind: output, shape index: {}]  }
   0x1   :  { %7 = vsyncpa [#allocation4], 0  ;;  %s12_s8 = sshll.u32 %s287_s0, 4  ;;  %s244_s9 = smov [#allocation2]   ;;  %s13_s8 = int_to_ptr.hbm [resolvable:$true] %s12_s8 }
   0x2   :  { %s14_s10 = sshll.u32 %s244_s9, 4  ;;  %s245_s11 = smov 128   ;;  %s15_s10 = int_to_ptr.vmem [resolvable:$true] %s14_s10 }
   0x3   :  { %s246_s12 = smov 8  }
   0x4   :  { %20 = dma.hbm_to_vmem [thread:$0]  %s13_s8, 256, %s15_s10, [#allocation3], %s245_s11, %s245_s11, %s246_s12  }
   0x5   :  { %240 = dma.done.wait [#allocation3], 256  }
   0x6   :  { %241 = vsyncadd [#allocation3], 4294967040  ;;  %v264_v0 = vld [vmem:[#allocation2] sm:$0xff]  ;;  %v266_v1 = vld [vmem:[#allocation2 + $0x8] sm:$0xff]  ;;  %vm42_vm0 = vcmask 1043456   ;;  %s247_s0 = smov [#allocation5]  }
   0x7   :  { %v27_v2 = vmul.f32 %v264_v0, %v264_v0  ;;  %v28_v3 = vmul.f32 %v266_v1, %v266_v1  ;;  %s157_s13 = sshll.u32 %s247_s0, 4  ;;  %s159_s16 = sshll.u32 %s288_s1, 4  ;;  %s158_s13 = int_to_ptr.vmem [resolvable:$true] %s157_s13  ;;  %s160_s16 = int_to_ptr.hbm [resolvable:$true] %s159_s16 }
   0x9   :  { %31 = vst [vmem:[#allocation1] ss:$2 sm:$0xff] %v27_v2 }
   0xa   :  { %35 = vst [vmem:[#allocation1 + $0x10] ss:$2 sm:$0xff] %v28_v3 }
  0x10   :  { %v32_v4 = vld.sshfl [vmem:[#allocation1] sm:$0xff pattern:$0x75316420]  ;;  %v33_v5 = vld.sshfl [vmem:[#allocation1 + $0x8] sm:$0xff pattern:$0x75316420] }
  0x11   :  { %v36_v6 = vld.sshfl [vmem:[#allocation1 + $0x10] sm:$0xff pattern:$0x75316420]  ;;  %v37_v7 = vld.sshfl [vmem:[#allocation1 + $0x18] sm:$0xff pattern:$0x75316420] }
  0x12   :  { %v43_v8 = vsel %vm42_vm0, %v32_v4, 0.0  ;;  %v50_v9 = vsel %vm42_vm0, %v33_v5, 0.0  ;;  %v57_v10 = vsel %vm42_vm0, %v36_v6, 0.0  ;;  %v64_v11 = vsel %vm42_vm0, %v37_v7, 0.0 }
  0x13   :  { %v44_v12 = vrot.slane %v43_v8, 4  ;;  %v51_v13 = vrot.slane %v50_v9, 4  ;;  %v58_v14 = vrot.slane %v57_v10, 4  ;;  %v65_v15 = vrot.slane %v64_v11, 4 }
  0x15   :  { %v45_v16 = vadd.f32 %v44_v12, %v43_v8  ;;  %v52_v17 = vadd.f32 %v51_v13, %v50_v9  ;;  %v59_v18 = vadd.f32 %v58_v14, %v57_v10  ;;  %v66_v19 = vadd.f32 %v65_v15, %v64_v11 }
  0x17   :  { %v46_v20 = vrot.slane %v45_v16, 2  ;;  %v53_v21 = vrot.slane %v52_v17, 2  ;;  %v60_v22 = vrot.slane %v59_v18, 2  ;;  %v67_v23 = vrot.slane %v66_v19, 2 }
  0x19   :  { %v47_v24 = vadd.f32 %v46_v20, %v45_v16  ;;  %v54_v25 = vadd.f32 %v53_v21, %v52_v17  ;;  %v61_v26 = vadd.f32 %v60_v22, %v59_v18  ;;  %v68_v27 = vadd.f32 %v67_v23, %v66_v19 }
  0x1b   :  { %v48_v28 = vrot.slane %v47_v24, 1  ;;  %v55_v29 = vrot.slane %v54_v25, 1  ;;  %v62_v30 = vrot.slane %v61_v26, 1  ;;  %v69_v31 = vrot.slane %v68_v27, 1 }
  0x1d   :  { %v49_v32 = vadd.f32 %v48_v28, %v47_v24  ;;  %v56_v33 = vadd.f32 %v55_v29, %v54_v25  ;;  %v63_v34 = vadd.f32 %v62_v30, %v61_v26  ;;  %v70_v35 = vadd.f32 %v69_v31, %v68_v27 }
  0x1f   :  { %176 = vrsqrt.f32 %v49_v32  ;;  %vm78_vm1 = vcmp.eq.f32.partialorder %v49_v32, inf  ;;  %vm80_vm2 = vcmp.eq.f32.partialorder %v49_v32, 0.0  ;;  %v81_v56 = vand.u32 2147483648, %v49_v32 }
  0x20   :  { %178 = vrsqrt.f32 %v56_v33  ;;  %vm90_vm3 = vcmp.eq.f32.partialorder %v56_v33, inf  ;;  %vm92_vm4 = vcmp.eq.f32.partialorder %v56_v33, 0.0  ;;  %v93_v62 = vand.u32 2147483648, %v56_v33 }
  0x21   :  { %180 = vrsqrt.f32 %v63_v34  ;;  %vm102_vm5 = vcmp.eq.f32.partialorder %v63_v34, inf  ;;  %vm104_vm6 = vcmp.eq.f32.partialorder %v63_v34, 0.0  ;;  %v105_v4 = vand.u32 2147483648, %v63_v34 }
  0x22   :  { %182 = vrsqrt.f32 %v70_v35  ;;  %vm114_vm7 = vcmp.eq.f32.partialorder %v70_v35, inf  ;;  %v117_v11 = vand.u32 2147483648, %v70_v35  ;;  %vm116_vm8 = vcmp.eq.f32.partialorder %v70_v35, 0.0 }
  0x25   :  { %v177_v36 = vpop.eup %176 }
  0x26   :  { %v179_v37 = vpop.eup %178  ;;  %v72_v38 = vmul.f32 %v177_v36, %v49_v32 }
  0x27   :  { %v181_v39 = vpop.eup %180  ;;  %v84_v40 = vmul.f32 %v179_v37, %v56_v33 }
  0x28   :  { %v183_v41 = vpop.eup %182  ;;  %v73_v42 = vmul.f32 %v177_v36, %v72_v38  ;;  %v96_v43 = vmul.f32 %v181_v39, %v63_v34 }
  0x29   :  { %v85_v44 = vmul.f32 %v179_v37, %v84_v40  ;;  %v108_v45 = vmul.f32 %v183_v41, %v70_v35 }
  0x2a   :  { %v74_v46 = vmul.f32 0.5, %v73_v42  ;;  %v97_v47 = vmul.f32 %v181_v39, %v96_v43 }
  0x2b   :  { %v86_v48 = vmul.f32 0.5, %v85_v44  ;;  %v109_v49 = vmul.f32 %v183_v41, %v108_v45 }
  0x2c   :  { %v75_v50 = vsub.f32 1.5, %v74_v46  ;;  %v98_v51 = vmul.f32 0.5, %v97_v47 }
  0x2d   :  { %v87_v52 = vsub.f32 1.5, %v86_v48  ;;  %v110_v53 = vmul.f32 0.5, %v109_v49 }
  0x2e   :  { %v76_v54 = vmul.f32 %v177_v36, %v75_v50  ;;  %v99_v55 = vsub.f32 1.5, %v98_v51 }
  0x2f   :  { %v88_v57 = vmul.f32 %v179_v37, %v87_v52  ;;  %v111_v58 = vsub.f32 1.5, %v110_v53 }
  0x30   :  { %v77_v59 = vmul.f32 %v76_v54, %v49_v32  ;;  %v100_v60 = vmul.f32 %v181_v39, %v99_v55 }
  0x31   :  { %v89_v61 = vmul.f32 %v88_v57, %v56_v33  ;;  %v112_v63 = vmul.f32 %v183_v41, %v111_v58 }
  0x32   :  { %v79_v2 = vsel %vm78_vm1, %v49_v32, %v77_v59  ;;  %v101_v3 = vmul.f32 %v100_v60, %v63_v34 }
  0x33   :  { %v82_v5 = vsel %vm80_vm2, %v81_v56, %v79_v2  ;;  %v91_v6 = vsel %vm90_vm3, %v56_v33, %v89_v61  ;;  %v113_v7 = vmul.f32 %v112_v63, %v70_v35 }
  0x34   :  { %v94_v8 = vsel %vm92_vm4, %v93_v62, %v91_v6  ;;  %v119_v9 = vadd.f32 1e-07, %v82_v5  ;;  %v103_v10 = vsel %vm102_vm5, %v63_v34, %v101_v3 }
  0x35   :  { %v120_v12 = vadd.f32 1e-07, %v94_v8  ;;  %v106_v13 = vsel %vm104_vm6, %v105_v4, %v103_v10  ;;  %v115_v14 = vsel %vm114_vm7, %v70_v35, %v113_v7 }
  0x36   :  { %184 = vrcp.f32 %v119_v9  ;;  %v118_v15 = vsel %vm116_vm8, %v117_v11, %v115_v14  ;;  %v121_v16 = vadd.f32 1e-07, %v106_v13 }
  0x37   :  { %186 = vrcp.f32 %v120_v12  ;;  %v122_v17 = vadd.f32 1e-07, %v118_v15 }
  0x38   :  { %188 = vrcp.f32 %v121_v16 }
  0x39   :  { %190 = vrcp.f32 %v122_v17 }
  0x3c   :  { %v185_v18 = vpop.eup %184 }
  0x3d   :  { %v187_v19 = vpop.eup %186  ;;  %v127_v20 = vmul.f32 %v185_v18, %v119_v9 }
  0x3e   :  { %v189_v21 = vpop.eup %188  ;;  %v128_v22 = vmul.f32 %v187_v19, %v120_v12 }
  0x3f   :  { %v191_v23 = vpop.eup %190  ;;  %v129_v24 = vmul.f32 %v189_v21, %v121_v16  ;;  %v131_v25 = vsub.f32 2.0, %v127_v20 }
  0x40   :  { %v132_v26 = vsub.f32 2.0, %v128_v22  ;;  %v130_v27 = vmul.f32 %v191_v23, %v122_v17 }
  0x41   :  { %v133_v29 = vsub.f32 2.0, %v129_v24  ;;  %v135_v31 = vmul.f32 %v185_v18, %v131_v25 }
  0x42   :  { %v136_v28 = vmul.f32 %v187_v19, %v132_v26  ;;  %v134_v30 = vsub.f32 2.0, %v130_v27 }
  0x43   :  { %v137_v35 = vmul.f32 %v189_v21, %v133_v29 }
  0x44   :  { %v143_v32 = vrot.slane %v136_v28, 4  ;;  %v138_v33 = vmul.f32 %v191_v23, %v134_v30 }
  0x46   :  { %v145_v34 = vsel %vm42_vm0, %v135_v31, %v143_v32  ;;  %v144_v36 = vrot.slane %v138_v33, 4 }
  0x47   :  { %v149_v37 = vmul.f32 %v145_v34, %v264_v0 }
  0x48   :  { %v146_v38 = vsel %vm42_vm0, %v137_v35, %v144_v36 }
  0x49   :  { %151 = vst [vmem:[#allocation5] sm:$0xff] %v149_v37  ;;  %v150_v39 = vmul.f32 %v146_v38, %v266_v1 }
  0x4b   :  { %152 = vst [vmem:[#allocation5 + $0x8] sm:$0xff] %v150_v39 }
  0x4c   :  { %165 = dma.vmem_to_hbm [thread:$0]  %s158_s13, 256, %s160_s16, [#allocation4], %s245_s11, %s245_s11, %s246_s12  }
  0x4d   :  { %242 = dma.done.wait [#allocation4], 256  }
  0x4e   :  { %243 = vsyncadd [#allocation4], 4294967040 }
  0x4f   :  { %170 = vsyncpa [#allocation3], 1 }
  0x50   :  { %171 = vsyncpa [#allocation4], 1 }

</bundles_post_ra>
